<compile_context>
chip_gen: v6e
topology: v6e:2x2x1
jax: 0.10.0
libtpu: 0.0.40
codegen_flags: <defaults>
</compile_context>

<pallas_src>
import functools
import math

import jax
import jax.numpy as jnp
from jax.experimental import pallas as pl
from jax.experimental.pallas import tpu as pltpu


# ------------------------------------------------------------------ kernel ---
def _interp_kernel(m_ref, x_ref, o_ref):
    # m_ref: (k*W_in, k*W_out)  resident block-diagonal interp matrix (f32)
    # x_ref: (TM, k*W_in)       packed input tile (contiguous rows)
    # o_ref: (TM, k*W_out)      packed output tile (lane-dense stores)
    o_ref[...] = jnp.dot(
        x_ref[...], m_ref[...], preferred_element_type=jnp.float32
    ).astype(o_ref.dtype)


# ------------------------------------------------------------------ sizing ---
def _round_up(x: int, n: int) -> int:
    return ((x + n - 1) // n) * n


def _vmem_limits():
    """(vmem_limit_bytes, tile_budget_bytes), generation-aware."""
    try:
        cap = int(pltpu.get_tpu_info().vmem_capacity_bytes)
    except Exception:
        cap = 64 * 1024 * 1024  # conservative fallback = v7x physical VMEM
    limit = max(cap // 2, 16 * 1024 * 1024)   # scoped limit we request
    tile_budget = (limit * 3) // 4            # leave 25% headroom inside it
    return limit, tile_budget


def _choose_tm(rows: int, kin: int, kout: int, itemsize: int, tile_budget: int) -> int:
    """Pick the packed-row tile so resident matrix + double-buffered tiles fit."""
    matrix_bytes = 2 * kin * kout * 4            # f32 matrix, assume 2 buffers
    avail = max(tile_budget - matrix_bytes, 2 * 1024 * 1024)
    bytes_per_row = 2 * (kin + kout) * itemsize  # double-buffered in + out tiles
    tm = avail // bytes_per_row
    tm = min(tm, 16384)                          # diminishing returns beyond this
    tm = min(tm, rows)                           # clamp to problem size
    tm = max((tm // 8) * 8, 8)                   # sublane multiple
    return int(tm)


# ------------------------------------------------------------- pallas call ---
def _interp_packed(x_pack, mblk, tm, vmem_limit):
    rows, kin = x_pack.shape
    kout = mblk.shape[1]
    grid = (pl.cdiv(rows, tm),)
    return pl.pallas_call(
        _interp_kernel,
        out_shape=jax.ShapeDtypeStruct((rows, kout), x_pack.dtype),
        grid=grid,
        in_specs=[
            pl.BlockSpec((kin, kout), lambda i: (0, 0)),  # resident matrix
            pl.BlockSpec((tm, kin), lambda i: (i, 0)),    # streamed input rows
        ],
        out_specs=pl.BlockSpec((tm, kout), lambda i: (i, 0)),
        compiler_params=pltpu.CompilerParams(
            dimension_semantics=("parallel",),
            vmem_limit_bytes=int(vmem_limit),
        ),
    )(mblk, x_pack)


# --------------------------------------------------------- interp weights ----
@functools.lru_cache(maxsize=None)
def _build_packed_matrix(w_in: int, w_out: int, scale: float, k: int):
    """Block-diagonal (k*W_in, k*W_out) f32 matrix reproducing
    F.interpolate(mode='linear', align_corners=False, recompute_scale_factor=None)."""
    dst = jnp.arange(w_out, dtype=jnp.float32)
    # PyTorch uses 1/scale_factor directly when recompute_scale_factor is None.
    src = jnp.maximum((dst + 0.5) / scale - 0.5, 0.0)  # clamp negatives (align_corners=False)
    x0 = jnp.minimum(jnp.floor(src).astype(jnp.int32), w_in - 1)
    x1 = jnp.minimum(x0 + 1, w_in - 1)
    lam = src - x0.astype(jnp.float32)
    # m[i, j] = weight of input i for output j     -> shape (W_in, W_out)
    m = (
        jax.nn.one_hot(x0, w_in, dtype=jnp.float32) * (1.0 - lam)[:, None]
        + jax.nn.one_hot(x1, w_in, dtype=jnp.float32) * lam[:, None]
    ).T
    eye = jnp.eye(k, dtype=jnp.float32)
    mblk = jnp.einsum("ab,ij->aibj", eye, m).reshape(k * w_in, k * w_out)
    return mblk


# ------------------------------------------------------------------- glue ----
class LinearInterp:
    """JAX/Pallas counterpart of the PyTorch `Linear` module."""

    def __init__(self, scale):
        self.scale = float(scale)

    def __call__(self, x):
        # x: (N, C, W_in)
        n, c, w_in = x.shape
        w_out = int(math.floor(w_in * self.scale))
        k = 128 // math.gcd(128, w_in)  # pack k original rows per packed row
        mblk = _build_packed_matrix(w_in, w_out, self.scale, k)  # (k*W_in, k*W_out)

        m_rows = n * c
        x2d = x.reshape(m_rows, w_in)
        # pad rows only to a multiple of 8*k (packing + sublane rule), not of TM
        m_pad = _round_up(m_rows, 8 * k)
        if m_pad != m_rows:
            x2d = jnp.pad(x2d, ((0, m_pad - m_rows), (0, 0)))
        rows = m_pad // k
        x_pack = x2d.reshape(rows, k * w_in)  # free, contiguous reshape

        vmem_limit, tile_budget = _vmem_limits()
        tm = _choose_tm(rows, k * w_in, k * w_out, x.dtype.itemsize, tile_budget)

        out_pack = _interp_packed(x_pack, mblk, tm, vmem_limit)  # (rows, k*W_out)
        out2d = out_pack.reshape(m_pad, w_out)[:m_rows]          # free reshape + slice
        return out2d.reshape(n, c, w_out)


# --------------------------------------------------------------- reference ---
def _reference(x, scale):
    n, c, w_in = x.shape
    w_out = int(math.floor(w_in * scale))
    dst = jnp.arange(w_out, dtype=jnp.float32)
    src = jnp.maximum((dst + 0.5) / scale - 0.5, 0.0)
    x0 = jnp.minimum(jnp.floor(src).astype(jnp.int32), w_in - 1)
    x1 = jnp.minimum(x0 + 1, w_in - 1)
    lam = src - x0.astype(jnp.float32)
    g0 = x[:, :, x0]
    g1 = x[:, :, x1]
    return g0 * (1.0 - lam) + g1 * lam


# ------------------------------------------------------------------- main ----
if __name__ == "__main__":
    key = jax.random.PRNGKey(0)
    N, C, W = 2, 4, 16
    scale = 2.0
    x = jax.random.normal(key, (N, C, W), dtype=jnp.float32)

    mod = LinearInterp(scale)
    out = mod(x)
    out = jax.block_until_ready(out)

    ref = _reference(x, scale)
    assert out.shape == (N, C, int(W * scale)), out.shape
    assert jnp.allclose(out, ref, atol=1e-5, rtol=1e-5), "mismatch vs reference"

    print("KERNEL_OK")
</pallas_src>

<mosaic_0001>
module attributes {stable_mosaic.version = 11 : i64} {
  func.func @_interp_kernel(%arg0: i32, %arg1: memref<128x256xf32, #tpu.memory_space<vmem>>, %arg2: memref<8x128xf32, #tpu.memory_space<vmem>>, %arg3: memref<8x256xf32, #tpu.memory_space<vmem>>) attributes {dimension_semantics = [#tpu.dimension_semantics<parallel>], iteration_bounds = array<i64: 1>, scalar_prefetch = 0 : i64, scratch_operands = 0 : i64, tpu.core_type = #tpu.core_type<tc>, window_params = [{pipeline_mode = #tpu.pipeline_mode<synchronous>, transform_indices = @transform_0, window_bounds = array<i64: 128, 256>}, {transform_indices = @transform_1, window_bounds = array<i64: 8, 128>}, {transform_indices = @transform_2, window_bounds = array<i64: 8, 256>}]} {
    %c0 = arith.constant 0 : index
    %c0_0 = arith.constant 0 : index
    %0 = vector.load %arg2[%c0, %c0_0] : memref<8x128xf32, #tpu.memory_space<vmem>>, vector<8x128xf32>
    %c0_1 = arith.constant 0 : index
    %c0_2 = arith.constant 0 : index
    %1 = vector.load %arg1[%c0_1, %c0_2] : memref<128x256xf32, #tpu.memory_space<vmem>>, vector<128x256xf32>
    %cst = arith.constant dense<0.000000e+00> : vector<8x256xf32>
    %2 = tpu.matmul %0, %1, %cst {dimension_numbers = #tpu.dot_dimension_numbers<[1], [0], [0], [1], [0, 0, 1, 1], [], []>} : vector<8x128xf32>, vector<128x256xf32>, vector<8x256xf32> -> vector<8x256xf32>
    %c0_3 = arith.constant 0 : index
    %c0_4 = arith.constant 0 : index
    %3 = vector.load %arg3[%c0_3, %c0_4] : memref<8x256xf32, #tpu.memory_space<vmem>>, vector<8x256xf32>
    tpu.vector_store %arg3[%c0_3, %c0_4], %2 {strides = array<i32>} : memref<8x256xf32, #tpu.memory_space<vmem>>, vector<8x256xf32>,
    return
  }
  func.func @transform_0(%arg0: i32) -> (i32, i32) {
    %c0_i32 = arith.constant 0 : i32
    %c0_i32_0 = arith.constant 0 : i32
    %c0_i32_1 = arith.constant 0 : i32
    return %c0_i32, %c0_i32_0 : i32, i32
  }
  func.func @transform_1(%arg0: i32) -> (i32, i32) {
    %c0_i32 = arith.constant 0 : i32
    %c0_i32_0 = arith.constant 0 : i32
    return %arg0, %c0_i32 : i32, i32
  }
  func.func @transform_2(%arg0: i32) -> (i32, i32) {
    %c0_i32 = arith.constant 0 : i32
    %c0_i32_0 = arith.constant 0 : i32
    return %arg0, %c0_i32 : i32, i32
  }
}

</mosaic_0001>

<bundles_post_ra>
// kernel: tpu_custom_call.1
= control target key start
LH: loop header
LB: loop body
LE: loop exit
PB: predicated region body
PF: predicated region fallthrough
CT: control target
= control target key end

     0   :  { %7 = vsyncpa [#allocation3], 0  ;;  %s262_s0 = inlined_call_operand.hbm [shape: f32[128,256], index: 0, kind: input, shape index: {}]   ;;  %s263_s1 = inlined_call_operand.hbm [shape: f32[8,128], index: 1, kind: input, shape index: {}]   ;;  %s264_s2 = inlined_call_operand.hbm [shape: f32[8,256], index: 2, kind: output, shape index: {}]  }
   0x1   :  { %8 = vsyncpa [#allocation6], 0 }
   0x2   :  { %9 = vsyncpa [#allocation4], 0  ;;  %s232_s9 = smov [#allocation2]  }
   0x3   :  { %s15_s10 = sshll.u32 %s232_s9, 4  ;;  %s16_s10 = int_to_ptr.vmem [resolvable:$true] %s15_s10 }
   0x4   :  { %s174_s11 = scalar_lea.vmem %s16_s10, 4096  ;;  %p179_p1 = scmp.lt.s32.totalorder %s16_s10, %s16_s10 }
   0x5   :  { %p175_p0 = scmp.ne.s32.totalorder %s16_s10, %s174_s11  ;;  %p180_p2 = scmp.lt.s32.totalorder %s174_s11, %s174_s11 }
   0x7   :  { %p181_p3 = por %p180_p2, %p179_p1 }
   0x9   :  { %p182_p4 = pnand %p181_p3, %p175_p0 }
   0xb   :  { %185 = shalt.err (!%p182_p4)
}
   0xc   :  { %s233_s12 = smov 256   ;;  %s234_s13 = smov 16  }
   0xd   :  { %21 = dma.hbm_to_vmem [thread:$0]  %s262_s0, 4096, %s16_s10, [#allocation3], %s233_s12, %s233_s12, %s234_s13  }
   0xe   :  { %s235_s16 = smov [#allocation5]  }
   0xf   :  { %s28_s17 = sshll.u32 %s235_s16, 4  ;;  %s29_s17 = int_to_ptr.vmem [resolvable:$true] %s28_s17 }
  0x10   :  { %s194_s18 = scalar_lea.vmem %s29_s17, 128  ;;  %p199_p6 = scmp.lt.s32.totalorder %s29_s17, %s29_s17 }
  0x11   :  { %p195_p5 = scmp.ne.s32.totalorder %s29_s17, %s194_s18  ;;  %p200_p7 = scmp.lt.s32.totalorder %s194_s18, %s194_s18 }
  0x13   :  { %p201_p8 = por %p200_p7, %p199_p6 }
  0x15   :  { %p202_p9 = pnand %p201_p8, %p195_p5 }
  0x17   :  { %205 = shalt.err (!%p202_p9)
}
  0x18   :  { %31 = dma.hbm_to_vmem [thread:$0]  %s263_s1, 128, %s29_s17, [#allocation6]  }
  0x19   :  { %226 = dma.done.wait [#allocation3], 4096  }
  0x1a   :  { %227 = vsyncadd [#allocation3], 4294963200 }
  0x1b   :  { %228 = dma.done.wait [#allocation6], 128  }
  0x1c   :  { %229 = vsyncadd [#allocation6], 4294967168  ;;  %v236_v0 = vmov 0.0   ;;  %v70_v1 = vld [vmem:[#allocation2 + $0xf8] sm:$0xff]  ;;  %v69_v2 = vld [vmem:[#allocation2 + $0xf0] sm:$0xff]  ;;  %s237_s0 = smov [#allocation7]  }
  0x1d   :  { %135 = vmatprep.mubr.f32.mxu0 %v236_v0  ;;  %v68_v3 = vld [vmem:[#allocation2 + $0xe8] sm:$0xff]  ;;  %71 = vmatprep.subr.mxu0 %v70_v1  ;;  %v67_v4 = vld [vmem:[#allocation2 + $0xe0] sm:$0xff]  ;;  %v66_v5 = vld [vmem:[#allocation2 + $0xd8] sm:$0xff]  ;;  %s150_s1 = sshll.u32 %s237_s0, 4  ;;  %s151_s1 = int_to_ptr.vmem [resolvable:$true] %s150_s1 }
  0x1e   :  { %72 = vmatpush1.msra.mxu0 %v69_v2  ;;  %v65_v6 = vld [vmem:[#allocation2 + $0xd0] sm:$0xff]  ;;  %v64_v7 = vld [vmem:[#allocation2 + $0xc8] sm:$0xff]  ;;  %v63_v8 = vld [vmem:[#allocation2 + $0xc0] sm:$0xff]  ;;  %s206_s21 = scalar_lea.vmem %s151_s1, 256  ;;  %p211_p11 = scmp.lt.s32.totalorder %s151_s1, %s151_s1 }
  0x1f   :  { %73 = vmatprep.subr.mxu0 %v68_v3  ;;  %v62_v9 = vld [vmem:[#allocation2 + $0xb8] sm:$0xff]  ;;  %v61_v10 = vld [vmem:[#allocation2 + $0xb0] sm:$0xff]  ;;  %v60_v11 = vld [vmem:[#allocation2 + $0xa8] sm:$0xff]  ;;  %p207_p10 = scmp.ne.s32.totalorder %s151_s1, %s206_s21  ;;  %p212_p12 = scmp.lt.s32.totalorder %s206_s21, %s206_s21 }
  0x20   :  { %74 = vmatpush1.msra.mxu0 %v67_v4  ;;  %v59_v12 = vld [vmem:[#allocation2 + $0xa0] sm:$0xff]  ;;  %v58_v13 = vld [vmem:[#allocation2 + $0x98] sm:$0xff]  ;;  %v57_v14 = vld [vmem:[#allocation2 + $0x90] sm:$0xff] }
  0x21   :  { %75 = vmatprep.subr.mxu0 %v66_v5  ;;  %v56_v15 = vld [vmem:[#allocation2 + $0x88] sm:$0xff]  ;;  %v55_v16 = vld [vmem:[#allocation2 + $0x80] sm:$0xff]  ;;  %v54_v17 = vld [vmem:[#allocation2 + $0x78] sm:$0xff]  ;;  %p213_p13 = por %p212_p12, %p211_p11 }
  0x22   :  { %76 = vmatpush1.msra.mxu0 %v65_v6  ;;  %v53_v18 = vld [vmem:[#allocation2 + $0x70] sm:$0xff]  ;;  %v52_v19 = vld [vmem:[#allocation2 + $0x68] sm:$0xff]  ;;  %v51_v20 = vld [vmem:[#allocation2 + $0x60] sm:$0xff] }
  0x23   :  { %77 = vmatprep.subr.mxu0 %v64_v7  ;;  %v50_v21 = vld [vmem:[#allocation2 + $0x58] sm:$0xff]  ;;  %v49_v22 = vld [vmem:[#allocation2 + $0x50] sm:$0xff]  ;;  %v48_v23 = vld [vmem:[#allocation2 + $0x48] sm:$0xff]  ;;  %p214_p0 = pnand %p213_p13, %p207_p10 }
  0x24   :  { %78 = vmatpush1.msra.mxu0 %v63_v8  ;;  %v47_v24 = vld [vmem:[#allocation2 + $0x40] sm:$0xff]  ;;  %v46_v25 = vld [vmem:[#allocation2 + $0x38] sm:$0xff]  ;;  %v45_v26 = vld [vmem:[#allocation2 + $0x30] sm:$0xff] }
  0x25   :  { %79 = vmatprep.subr.mxu0 %v62_v9  ;;  %v44_v27 = vld [vmem:[#allocation2 + $0x28] sm:$0xff]  ;;  %v43_v28 = vld [vmem:[#allocation2 + $0x20] sm:$0xff]  ;;  %v42_v29 = vld [vmem:[#allocation2 + $0x18] sm:$0xff] }
  0x26   :  { %80 = vmatpush1.msra.mxu0 %v61_v10  ;;  %v41_v30 = vld [vmem:[#allocation2 + $0x10] sm:$0xff]  ;;  %v40_v31 = vld [vmem:[#allocation2 + $0x8] sm:$0xff]  ;;  %v39_v32 = vld [vmem:[#allocation2] sm:$0xff] }
  0x27   :  { %81 = vmatprep.subr.mxu0 %v60_v11  ;;  %v38_v33 = vld [vmem:[#allocation5] sm:$0xff] }
  0x28   :  { %82 = vmatpush1.msra.mxu0 %v59_v12 }
  0x29   :  { %83 = vmatprep.subr.mxu0 %v58_v13 }
  0x2a   :  { %84 = vmatpush1.msra.mxu0 %v57_v14 }
  0x2b   :  { %85 = vmatprep.subr.mxu0 %v56_v15 }
  0x2c   :  { %86 = vmatpush1.msra.mxu0 %v55_v16 }
  0x2d   :  { %87 = vmatprep.subr.mxu0 %v54_v17 }
  0x2e   :  { %88 = vmatpush1.msra.mxu0 %v53_v18 }
  0x2f   :  { %89 = vmatprep.subr.mxu0 %v52_v19 }
  0x30   :  { %90 = vmatpush1.msra.mxu0 %v51_v20 }
  0x31   :  { %91 = vmatprep.subr.mxu0 %v50_v21 }
  0x32   :  { %92 = vmatpush1.msra.mxu0 %v49_v22 }
  0x33   :  { %93 = vmatprep.subr.mxu0 %v48_v23 }
  0x34   :  { %94 = vmatpush1.msra.mxu0 %v47_v24 }
  0x35   :  { %95 = vmatprep.subr.mxu0 %v46_v25 }
  0x36   :  { %96 = vmatpush1.msra.mxu0 %v45_v26 }
  0x37   :  { %97 = vmatprep.subr.mxu0 %v44_v27 }
  0x38   :  { %98 = vmatpush1.msra.mxu0 %v43_v28 }
  0x39   :  { %99 = vmatprep.subr.mxu0 %v42_v29 }
  0x3a   :  { %100 = vmatpush1.msra.mxu0 %v41_v30 }
  0x3b   :  { %101 = vmatprep.subr.mxu0 %v40_v31 }
  0x3c   :  { %102 = vmatpush1.msra.mxu0 %v39_v32 }
  0x3d   :  { %136 = vmatmul.mubr.f32.vlgmr.msra.gmra.mxu0 %v38_v33 }
  0xfd   :  { %v137_v34 = vpop.f32.mrf.mxu0 }
  0xfe   :  { %142 = vst [vmem:[#allocation7] sm:$0xff] %v137_v34 }
  0xff   :  { %v139_v35 = vpop.f32.mrf.mxu0 }
 0x100   :  { %143 = vst [vmem:[#allocation7 + $0x8] sm:$0xff] %v139_v35 }
 0x101   :  { %217 = shalt.err (!%p214_p0)
}
 0x102   :  { %153 = dma.vmem_to_hbm [thread:$0]  %s151_s1, 256, %s264_s2, [#allocation4]  }
 0x103   :  { %230 = dma.done.wait [#allocation4], 256  }
 0x104   :  { %231 = vsyncadd [#allocation4], 4294967040 }
 0x105   :  { %157 = vsyncpa [#allocation3], 1 }
 0x106   :  { %158 = vsyncpa [#allocation6], 1 }
 0x107   :  { %159 = vsyncpa [#allocation4], 1 }

</bundles_post_ra>
